<compile_context>
chip_gen: v7x
topology: tpu7x:2x2x1
jax: 0.10.0
libtpu: 0.0.40
codegen_flags: <defaults>
</compile_context>

<pallas_src>
import functools

import jax
import jax.numpy as jnp
from jax.experimental import pallas as pl
from jax.experimental.pallas import tpu as pltpu

_EPS = 1e-5
_VMEM = pl.BlockSpec(memory_space=pltpu.MemorySpace.VMEM)


def _round_up(x, m):
    return ((x + m - 1) // m) * m


# ---------------------------------------------------------------------------
# Fused Pallas kernel: [conv1 taps | conv3] -> BN1 -> ReLU -> conv2 -> BN2 -> +r -> ReLU
# ---------------------------------------------------------------------------
def _residual_kernel(x1_ref, w13_ref, w2_ref, pc_ref, mk_ref, o_ref, *,
                     n_valid, mask_lanes, k2_pad, eps):
    cout, n_pad = o_ref.shape
    inv_n = 1.0 / float(n_valid)
    dot = functools.partial(jnp.dot, preferred_element_type=jnp.float32)

    pc = pc_ref[...]                                           # (Cout, 8) packed params
    g1, be1, g2, be2, b3 = (pc[:, i:i + 1] for i in range(5))

    mk = mk_ref[...]                                           # (8, Np) packed masks
    lane_valid, keep_l, keep_r = mk[0:1, :], mk[1:2, :], mk[2:3, :]

    def batchnorm(y, g, be):
        # Train-mode batch stats over the valid lanes only (biased variance, as in
        # PyTorch's normalization).  Sum and sum-of-squares share one reduction.
        ym = y * lane_valid if mask_lanes else y
        s = jnp.sum(jnp.concatenate([ym, ym * ym], axis=0), axis=1, keepdims=True)
        c = y.shape[0]
        mu = s[:c] * inv_n
        var = s[c:] * inv_n - mu * mu
        a = g * jax.lax.rsqrt(var + eps)                       # fused BN affine
        return y * a + (be - mu * a)

    # conv1 (all three taps, stride folded into the slab) + 1x1 shortcut: ONE matmul.
    y1r = dot(w13_ref[...], x1_ref[...])                       # (2*Cout, Np) f32
    y = jnp.maximum(batchnorm(y1r[:cout], g1, be1), 0.0)       # BN1 + ReLU (b1 is inert)
    r = y1r[cout:] + b3                                        # shortcut conv3 + bias

    # conv2 (1x3, stride 1): neighbour taps via XLU roll + precomputed per-sample
    # boundary masks, fused into one matmul over the concatenated slab.
    yl = pltpu.roll(y, shift=1, axis=1) * keep_l               # y[col-1], 0 at left edge
    yr = pltpu.roll(y, shift=n_pad - 1, axis=1) * keep_r       # y[col+1], 0 at right edge
    parts = [yl, y, yr]
    if k2_pad:                                                 # pad K to bf16 tile
        parts.append(jnp.zeros((k2_pad, n_pad), jnp.float32))
    y2 = jnp.concatenate(parts, axis=0).astype(jnp.bfloat16)   # (K2p, Np)
    z = batchnorm(dot(w2_ref[...], y2), g2, be2)               # b2 is inert before BN2

    o_ref[...] = jnp.maximum(z + r, 0.0)


# ---------------------------------------------------------------------------
# Wrapper: compact layout prep + single pallas_call
# ---------------------------------------------------------------------------
def residual_forward(params, x, *, stride):
    """x: (B, Cin, H, W) NCHW -> (B, Cout, H_out, W_out), matching the PyTorch module."""
    b, cin, h, w = x.shape
    cout = params["w1"].shape[0]
    h_out = (h - 1) // stride + 1
    w_out = (w - 1) // stride + 1
    n_valid = b * h_out * w_out
    n_pad = _round_up(max(n_valid, 128), 128)                  # lane-dense slab width

    k1 = 3 * cin
    k1p = _round_up(k1, 16)                                    # bf16 sublane alignment
    k2 = 3 * cout
    k2p = _round_up(k2, 16)

    # Input tap slab (k1p, Np): row = tap*Cin + c, col = (b*H_out + h)*W_out + wo.
    xs = x[:, :, ::stride, :]                                  # 1x3 kernel: row subsample
    xp = jnp.pad(xs, ((0, 0), (0, 0), (0, 0), (1, 1)))         # zero pad along W
    tap_idx = jnp.arange(3)[:, None] + (jnp.arange(w_out) * stride)[None, :]
    taps = xp[:, :, :, tap_idx]                                # (B, Cin, H_out, 3, W_out)
    x1 = jnp.transpose(taps, (3, 1, 0, 2, 4)).reshape(k1, n_valid)
    x1 = jnp.pad(x1, ((0, k1p - k1), (0, n_pad - n_valid))).astype(jnp.bfloat16)

    # Packed weight: rows 0:Cout = conv1 (tap-major cols), rows Cout:2Cout = conv3
    # in the centre-tap block (1x1 stride-s conv reads exactly the centre columns).
    w1p = jnp.transpose(params["w1"], (0, 2, 1)).reshape(cout, k1)
    zc = jnp.zeros((cout, cin), jnp.float32)
    w3p = jnp.concatenate([zc, params["w3"], zc], axis=1)
    w13 = jnp.concatenate([w1p, w3p], axis=0)
    w13 = jnp.pad(w13, ((0, 0), (0, k1p - k1))).astype(jnp.bfloat16)

    # conv2 weight, tap-major columns, K padded to match the in-kernel y2 slab.
    w2p = jnp.transpose(params["w2"], (0, 2, 1)).reshape(cout, k2)
    w2p = jnp.pad(w2p, ((0, 0), (0, k2p - k2))).astype(jnp.bfloat16)

    # Per-channel params (one DMA): g1, be1, g2, be2, b3.  (b1/b2 are dead before BN.)
    zch = jnp.zeros((cout,), jnp.float32)
    pc = jnp.stack([params["g1"], params["be1"], params["g2"], params["be2"],
                    params["b3"], zch, zch, zch], axis=1)      # (Cout, 8)

    # Lane masks (one DMA): valid-lane mask + conv2 left/right boundary keep-masks.
    col = jnp.arange(n_pad, dtype=jnp.int32)
    wo = col % w_out
    zl = jnp.zeros((n_pad,), jnp.float32)
    mk = jnp.stack([(col < n_valid).astype(jnp.float32),
                    (wo != 0).astype(jnp.float32),
                    (wo != w_out - 1).astype(jnp.float32),
                    zl, zl, zl, zl, zl], axis=0)               # (8, Np)

    kernel = functools.partial(_residual_kernel, n_valid=n_valid,
                               mask_lanes=(n_valid != n_pad),
                               k2_pad=k2p - k2, eps=_EPS)
    out = pl.pallas_call(
        kernel,
        out_shape=jax.ShapeDtypeStruct((cout, n_pad), jnp.float32),
        in_specs=[_VMEM] * 5,
        out_specs=_VMEM,
    )(x1, w13, w2p, pc, mk)

    out = out[:, :n_valid].reshape(cout, b, h_out, w_out)
    return jnp.transpose(out, (1, 0, 2, 3))                    # (B, Cout, H_out, W_out)


# ---------------------------------------------------------------------------
# Deterministic synthetic parameters (b1/b2 kept for the reference path)
# ---------------------------------------------------------------------------
def init_params(key, cin, cout):
    ks = jax.random.split(key, 10)
    return {
        "w1": 0.2 * jax.random.normal(ks[0], (cout, cin, 3), jnp.float32),
        "b1": 0.1 * jax.random.normal(ks[1], (cout,), jnp.float32),
        "g1": 1.0 + 0.1 * jax.random.normal(ks[2], (cout,), jnp.float32),
        "be1": 0.1 * jax.random.normal(ks[3], (cout,), jnp.float32),
        "w2": 0.2 * jax.random.normal(ks[4], (cout, cout, 3), jnp.float32),
        "b2": 0.1 * jax.random.normal(ks[5], (cout,), jnp.float32),
        "g2": 1.0 + 0.1 * jax.random.normal(ks[6], (cout,), jnp.float32),
        "be2": 0.1 * jax.random.normal(ks[7], (cout,), jnp.float32),
        "w3": 0.2 * jax.random.normal(ks[8], (cout, cin), jnp.float32),
        "b3": 0.1 * jax.random.normal(ks[9], (cout,), jnp.float32),
    }


# ---------------------------------------------------------------------------
# Pure-JAX reference (independent path: lax.conv_general_dilated) for validation
# ---------------------------------------------------------------------------
def _ref_conv(x, w, b, stride, pad_w):
    y = jax.lax.conv_general_dilated(
        x, w, window_strides=(stride, stride),
        padding=((0, 0), (pad_w, pad_w)),
        dimension_numbers=("NCHW", "OIHW", "NCHW"),
        precision=jax.lax.Precision.HIGHEST)
    return y + b[None, :, None, None]


def _ref_bn(y, g, be):
    mu = jnp.mean(y, axis=(0, 2, 3), keepdims=True)
    var = jnp.mean((y - mu) ** 2, axis=(0, 2, 3), keepdims=True)
    return ((y - mu) * jax.lax.rsqrt(var + _EPS) * g[None, :, None, None]
            + be[None, :, None, None])


def ref_forward(params, x, stride):
    w1 = params["w1"][:, :, None, :]
    w2 = params["w2"][:, :, None, :]
    w3 = params["w3"][:, :, None, None]
    y = jax.nn.relu(_ref_bn(_ref_conv(x, w1, params["b1"], stride, 1),
                            params["g1"], params["be1"]))
    y = _ref_bn(_ref_conv(y, w2, params["b2"], 1, 1), params["g2"], params["be2"])
    r = _ref_conv(x, w3, params["b3"], stride, 0)
    return jax.nn.relu(y + r)


if __name__ == "__main__":
    configs = [
        dict(B=4, CIN=4, COUT=8, H=1, W=64, STRIDE=2),   # n_valid = 128 (unmasked path)
        dict(B=2, CIN=4, COUT=8, H=3, W=30, STRIDE=1),   # n_valid = 180 (masked path)
    ]
    key = jax.random.PRNGKey(0)
    for cfg in configs:
        key, pkey, xkey = jax.random.split(key, 3)
        params = init_params(pkey, cfg["CIN"], cfg["COUT"])
        x = jax.random.normal(xkey, (cfg["B"], cfg["CIN"], cfg["H"], cfg["W"]),
                              jnp.float32)
        fwd = jax.jit(functools.partial(residual_forward, stride=cfg["STRIDE"]))
        out = jax.block_until_ready(fwd(params, x))

        h_out = (cfg["H"] - 1) // cfg["STRIDE"] + 1
        w_out = (cfg["W"] - 1) // cfg["STRIDE"] + 1
        assert out.shape == (cfg["B"], cfg["COUT"], h_out, w_out), out.shape
        assert bool(jnp.all(jnp.isfinite(out)))

        ref = ref_forward(params, x, cfg["STRIDE"])
        err = float(jnp.max(jnp.abs(out - ref)))
        # bf16 MXU operands with f32 accumulation vs a HIGHEST-precision f32 reference.
        assert err < 1e-1, err

    print("KERNEL_OK")
</pallas_src>

<mosaic_0001>
module attributes {stable_mosaic.version = 11 : i64} {
  func.func @_residual_kernel(%arg0: memref<16x128xbf16, #tpu.memory_space<vmem>>, %arg1: memref<16x16xbf16, #tpu.memory_space<vmem>>, %arg2: memref<8x32xbf16, #tpu.memory_space<vmem>>, %arg3: memref<8x8xf32, #tpu.memory_space<vmem>>, %arg4: memref<8x128xf32, #tpu.memory_space<vmem>>, %arg5: memref<8x128xf32, #tpu.memory_space<vmem>>) attributes {dimension_semantics = [], scalar_prefetch = 0 : i64, scratch_operands = 0 : i64, tpu.core_type = #tpu.core_type<tc>} {
    %c0 = arith.constant 0 : index
    %c0_0 = arith.constant 0 : index
    %0 = vector.load %arg3[%c0, %c0_0] : memref<8x8xf32, #tpu.memory_space<vmem>>, vector<8x8xf32>
    %1 = vector.extract_strided_slice %0 {offsets = [0, 0], sizes = [8, 1], strides = [1, 1]} : vector<8x8xf32> to vector<8x1xf32>
    %2 = vector.extract_strided_slice %0 {offsets = [0, 1], sizes = [8, 1], strides = [1, 1]} : vector<8x8xf32> to vector<8x1xf32>
    %3 = vector.extract_strided_slice %0 {offsets = [0, 2], sizes = [8, 1], strides = [1, 1]} : vector<8x8xf32> to vector<8x1xf32>
    %4 = vector.extract_strided_slice %0 {offsets = [0, 3], sizes = [8, 1], strides = [1, 1]} : vector<8x8xf32> to vector<8x1xf32>
    %5 = vector.extract_strided_slice %0 {offsets = [0, 4], sizes = [8, 1], strides = [1, 1]} : vector<8x8xf32> to vector<8x1xf32>
    %c0_1 = arith.constant 0 : index
    %c0_2 = arith.constant 0 : index
    %6 = vector.load %arg4[%c0_1, %c0_2] : memref<8x128xf32, #tpu.memory_space<vmem>>, vector<8x128xf32>
    %7 = vector.extract_strided_slice %6 {offsets = [1, 0], sizes = [1, 128], strides = [1, 1]} : vector<8x128xf32> to vector<1x128xf32>
    %8 = vector.extract_strided_slice %6 {offsets = [2, 0], sizes = [1, 128], strides = [1, 1]} : vector<8x128xf32> to vector<1x128xf32>
    %c0_3 = arith.constant 0 : index
    %c0_4 = arith.constant 0 : index
    %9 = vector.load %arg1[%c0_3, %c0_4] : memref<16x16xbf16, #tpu.memory_space<vmem>>, vector<16x16xbf16>
    %c0_5 = arith.constant 0 : index
    %c0_6 = arith.constant 0 : index
    %10 = vector.load %arg0[%c0_5, %c0_6] : memref<16x128xbf16, #tpu.memory_space<vmem>>, vector<16x128xbf16>
    %cst = arith.constant dense<0.000000e+00> : vector<16x128xf32>
    %11 = tpu.matmul %9, %10, %cst {dimension_numbers = #tpu.dot_dimension_numbers<[1], [0], [0], [1], [0, 0, 1, 1], [], []>} : vector<16x16xbf16>, vector<16x128xbf16>, vector<16x128xf32> -> vector<16x128xf32>
    %12 = vector.extract_strided_slice %11 {offsets = [0, 0], sizes = [8, 128], strides = [1, 1]} : vector<16x128xf32> to vector<8x128xf32>
    %13 = arith.mulf %12, %12 : vector<8x128xf32>
    %14 = tpu.concatenate %12, %13 in 0 : vector<8x128xf32>, vector<8x128xf32> -> vector<16x128xf32>
    %cst_7 = arith.constant dense<0.000000e+00> : vector<16xf32>
    %15 = vector.multi_reduction <add>, %14, %cst_7 [1] : vector<16x128xf32> to vector<16xf32>
    %16 = vector.shape_cast %15 : vector<16xf32> to vector<16x1xf32>
    %17 = vector.extract_strided_slice %16 {offsets = [0, 0], sizes = [8, 1], strides = [1, 1]} : vector<16x1xf32> to vector<8x1xf32>
    %cst_8 = arith.constant 7.812500e-03 : f32
    %18 = vector.broadcast %cst_8 : f32 to vector<8x1xf32>
    %19 = arith.mulf %17, %18 : vector<8x1xf32>
    %20 = vector.extract_strided_slice %16 {offsets = [8, 0], sizes = [8, 1], strides = [1, 1]} : vector<16x1xf32> to vector<8x1xf32>
    %cst_9 = arith.constant 7.812500e-03 : f32
    %21 = vector.broadcast %cst_9 : f32 to vector<8x1xf32>
    %22 = arith.mulf %20, %21 : vector<8x1xf32>
    %23 = arith.mulf %19, %19 : vector<8x1xf32>
    %24 = arith.subf %22, %23 : vector<8x1xf32>
    %cst_10 = arith.constant 9.99999974E-6 : f32
    %25 = vector.broadcast %cst_10 : f32 to vector<8x1xf32>
    %26 = arith.addf %24, %25 : vector<8x1xf32>
    %27 = math.rsqrt %26 : vector<8x1xf32>
    %28 = arith.mulf %1, %27 : vector<8x1xf32>
    %29 = vector.broadcast %28 : vector<8x1xf32> to vector<8x128xf32>
    %30 = arith.mulf %12, %29 : vector<8x128xf32>
    %31 = arith.mulf %19, %28 : vector<8x1xf32>
    %32 = arith.subf %2, %31 : vector<8x1xf32>
    %33 = vector.broadcast %32 : vector<8x1xf32> to vector<8x128xf32>
    %34 = arith.addf %30, %33 : vector<8x128xf32>
    %cst_11 = arith.constant 0.000000e+00 : f32
    %35 = vector.broadcast %cst_11 : f32 to vector<8x128xf32>
    %36 = arith.maximumf %34, %35 : vector<8x128xf32>
    %37 = vector.extract_strided_slice %11 {offsets = [8, 0], sizes = [8, 128], strides = [1, 1]} : vector<16x128xf32> to vector<8x128xf32>
    %38 = vector.broadcast %5 : vector<8x1xf32> to vector<8x128xf32>
    %39 = arith.addf %37, %38 : vector<8x128xf32>
    %c1_i32 = arith.constant 1 : i32
    %40 = tpu.dynamic_rotate %36 by %c1_i32 dim 1 : vector<8x128xf32>, i32 -> vector<8x128xf32>
    %41 = vector.broadcast %7 : vector<1x128xf32> to vector<8x128xf32>
    %42 = arith.mulf %40, %41 : vector<8x128xf32>
    %c127_i32 = arith.constant 127 : i32
    %43 = tpu.dynamic_rotate %36 by %c127_i32 dim 1 : vector<8x128xf32>, i32 -> vector<8x128xf32>
    %44 = vector.broadcast %8 : vector<1x128xf32> to vector<8x128xf32>
    %45 = arith.mulf %43, %44 : vector<8x128xf32>
    %cst_12 = arith.constant 0.000000e+00 : f32
    %46 = vector.broadcast %cst_12 : f32 to vector<8x128xf32>
    %47 = tpu.concatenate %42, %36, %45, %46 in 0 : vector<8x128xf32>, vector<8x128xf32>, vector<8x128xf32>, vector<8x128xf32> -> vector<32x128xf32>
    %48 = arith.truncf %47 : vector<32x128xf32> to vector<32x128xbf16>
    %c0_13 = arith.constant 0 : index
    %c0_14 = arith.constant 0 : index
    %49 = vector.load %arg2[%c0_13, %c0_14] : memref<8x32xbf16, #tpu.memory_space<vmem>>, vector<8x32xbf16>
    %cst_15 = arith.constant dense<0.000000e+00> : vector<8x128xf32>
    %50 = tpu.matmul %49, %48, %cst_15 {dimension_numbers = #tpu.dot_dimension_numbers<[1], [0], [0], [1], [0, 0, 1, 1], [], []>} : vector<8x32xbf16>, vector<32x128xbf16>, vector<8x128xf32> -> vector<8x128xf32>
    %51 = arith.mulf %50, %50 : vector<8x128xf32>
    %52 = tpu.concatenate %50, %51 in 0 : vector<8x128xf32>, vector<8x128xf32> -> vector<16x128xf32>
    %cst_16 = arith.constant dense<0.000000e+00> : vector<16xf32>
    %53 = vector.multi_reduction <add>, %52, %cst_16 [1] : vector<16x128xf32> to vector<16xf32>
    %54 = vector.shape_cast %53 : vector<16xf32> to vector<16x1xf32>
    %55 = vector.extract_strided_slice %54 {offsets = [0, 0], sizes = [8, 1], strides = [1, 1]} : vector<16x1xf32> to vector<8x1xf32>
    %cst_17 = arith.constant 7.812500e-03 : f32
    %56 = vector.broadcast %cst_17 : f32 to vector<8x1xf32>
    %57 = arith.mulf %55, %56 : vector<8x1xf32>
    %58 = vector.extract_strided_slice %54 {offsets = [8, 0], sizes = [8, 1], strides = [1, 1]} : vector<16x1xf32> to vector<8x1xf32>
    %cst_18 = arith.constant 7.812500e-03 : f32
    %59 = vector.broadcast %cst_18 : f32 to vector<8x1xf32>
    %60 = arith.mulf %58, %59 : vector<8x1xf32>
    %61 = arith.mulf %57, %57 : vector<8x1xf32>
    %62 = arith.subf %60, %61 : vector<8x1xf32>
    %cst_19 = arith.constant 9.99999974E-6 : f32
    %63 = vector.broadcast %cst_19 : f32 to vector<8x1xf32>
    %64 = arith.addf %62, %63 : vector<8x1xf32>
    %65 = math.rsqrt %64 : vector<8x1xf32>
    %66 = arith.mulf %3, %65 : vector<8x1xf32>
    %67 = vector.broadcast %66 : vector<8x1xf32> to vector<8x128xf32>
    %68 = arith.mulf %50, %67 : vector<8x128xf32>
    %69 = arith.mulf %57, %66 : vector<8x1xf32>
    %70 = arith.subf %4, %69 : vector<8x1xf32>
    %71 = vector.broadcast %70 : vector<8x1xf32> to vector<8x128xf32>
    %72 = arith.addf %68, %71 : vector<8x128xf32>
    %73 = arith.addf %72, %39 : vector<8x128xf32>
    %cst_20 = arith.constant 0.000000e+00 : f32
    %74 = vector.broadcast %cst_20 : f32 to vector<8x128xf32>
    %75 = arith.maximumf %73, %74 : vector<8x128xf32>
    %c0_21 = arith.constant 0 : index
    %c0_22 = arith.constant 0 : index
    %76 = vector.load %arg5[%c0_21, %c0_22] : memref<8x128xf32, #tpu.memory_space<vmem>>, vector<8x128xf32>
    tpu.vector_store %arg5[%c0_21, %c0_22], %75 {strides = array<i32>} : memref<8x128xf32, #tpu.memory_space<vmem>>, vector<8x128xf32>,
    return
  }
}

</mosaic_0001>

<bundles_post_ra>
// kernel: residual_forward.1
= control target key start
LH: loop header
LB: loop body
LE: loop exit
PB: predicated region body
PF: predicated region fallthrough
CT: control target
= control target key end

     0   :  { %v262_v0 = vmov 0.0   ;;  %vm263_vm0 = vmmov 0   ;;  %vm38_vm1 = vcmask 130048   ;;  %v264_v8 = vmov 0   ;;  %s266_s22 = smov 1   ;;  %s338_s0 = inlined_call_operand.vmem [shape: bf16[16,128], index: 0, kind: input, shape index: {}]   ;;  %s339_s1 = inlined_call_operand.vmem [shape: bf16[16,16], index: 1, kind: input, shape index: {}]   ;;  %s340_s3 = inlined_call_operand.vmem [shape: f32[8,8], index: 3, kind: input, shape index: {}]   ;;  %s341_s4 = inlined_call_operand.vmem [shape: f32[8,128], index: 4, kind: input, shape index: {}]   ;;  %s342_s2 = inlined_call_operand.vmem [shape: bf16[8,32], index: 2, kind: input, shape index: {}]   ;;  %s343_s5 = inlined_call_operand.vmem [shape: f32[8,128], index: 5, kind: output, shape index: {}]  }
   0x1   :  { %227 = vmatprep.subr.bf16.mxu0 %v262_v0  ;;  %v256_v1 = vld [vmem:[%s338_s0] sm:$0xff]   ;;  %229 = vmatprep.mubr.msk.bf16.mxu0 %vm263_vm0, %v262_v0  ;;  %v265_v16 = vmov 1   ;;  %v122_v28 = vlaneseq  ;;  %vm137_vm2 = vcmask 261120   ;;  %v268_v47 = vmov 2  }
   0x2   :  { %v257_v2 = vld [vmem:[%s339_s1] sm:$0xff]   ;;  %233 = vmatprep.subr.bf16.mxu1 %v262_v0  ;;  %237 = vmatprep.mubr.msk.bf16.mxu1 %vm263_vm0, %v262_v0  ;;  %v269_v55 = vmov 3   ;;  %v270_v59 = vmov 4  }
   0x3   :  { %228 = vmatpush3.bf16.msra.mxu0 %v256_v1  ;;  %250 = vset.pattern.permute.xlu1 %v264_v8  ;;  %v316_v17 = vld [vmem:[%s340_s3] sm:$0xff]  ;;  %s267_s3 = smov 127   ;;  %v123_v29 = vshrl.u32 %v122_v28, 7 }
   0x4   :  { %251 = vset.pattern.permute.xlu0 %v265_v16  ;;  %v22_v31 = vld [vmem:[%s341_s4] sm:$0xff] }
   0x5   :  { %v124_v30 = vsub.s32 1, %v123_v29  ;;  %v131_v33 = vsub.s32 2, %v123_v29  ;;  %v136_v41 = vld [vmem:[%s342_s2] sm:$0xf] }
   0x6   :  { %230 = vmatmul.mubr.msk.bf16.vlgmr.msra.gmra.mrb[0].mxu0 %vm38_vm1, %v257_v2 }
   0x7   :  { %v125_v32 = vrot.slane %v22_v31, %v124_v30  ;;  %v132_v36 = vrot.slane %v22_v31, %v131_v33 }
  0xd9   :  { %v76_v3 = vpop.f32.mrb[0].mxu0 }
  0xda   :  { %84 = vadd.xlane.f32.xlu0 %v76_v3  ;;  %v231_v4 = vpop.f32.mrb[1].mxu0  ;;  %v83_v7 = vmul.f32 %v76_v3, %v76_v3 }
  0xdb   :  { %v311_v5 = vpop.f32.mrb[2].mxu0 }
  0xdc   :  { %v232_v6 = vpop.f32.mrb[3].mxu0 }
  0xde   :  { %86 = vadd.xlane.f32.xlu0 %v83_v7 }
 0x167   :  { %v85_v9 = vpop.xlane.xlu0 %84 }
 0x168   :  { %v88_v10 = vmul.f32 0.0078125, %v85_v9 }
 0x16a   :  { %v90_v12 = vmul.f32 %v88_v10, %v88_v10 }
 0x16b   :  { %v87_v11 = vpop.xlane.xlu0 %86 }
 0x16c   :  { %v89_v13 = vmul.f32 0.0078125, %v87_v11 }
 0x16e   :  { %v91_v14 = vsub.f32 %v89_v13, %v90_v12 }
 0x170   :  { %v92_v15 = vadd.f32 1e-05, %v91_v14 }
 0x172   :  { %258 = vrsqrt.f32 %v92_v15 }
 0x17c   :  { %v259_v18 = vpop.eup %258 }
 0x17d   :  { %v94_v19 = vmul.f32 %v259_v18, %v316_v17 }
 0x17f   :  { %v101_v20 = vmul.f32 %v94_v19, %v88_v10 }
 0x181   :  { %103 = vrot.lane.b32.xlu1 %v101_v20, %s266_s22 }
 0x185   :  { %97 = vperm.xlu1 %250, %v94_v19  }
 0x189   :  { %252 = vset.pattern.permute.xlu1 %v268_v47 }
 0x1f3   :  { %v104_v21 = vpop.permute.xlu1 %103 }
 0x1f4   :  { %v106_v22 = vsub.f32 %v316_v17, %v104_v21 }
 0x1f6   :  { %109 = vperm.xlu0 %251, %v106_v22  }
 0x1fa   :  { %255 = vset.pattern.permute.xlu0 %v269_v55 }
 0x204   :  { %v98_v23 = vpop.permute.xlu1 %97 }
 0x205   :  { %v100_v24 = vmul.f32 %v98_v23, %v76_v3 }
 0x275   :  { %v110_v25 = vpop.permute.xlu0 %109 }
 0x276   :  { %v112_v26 = vadd.f32 %v110_v25, %v100_v24 }
 0x278   :  { %v113_v27 = vmax.f32 %v112_v26, 0.0 }
 0x27a   :  { %120 = vrot.lane.b32.xlu1 %v113_v27, %s266_s22 }
 0x27e   :  { %127 = vrot.lane.b32.xlu1 %v113_v27, %s267_s3 }
 0x2ec   :  { %v121_v34 = vpop.permute.xlu1 %120 }
 0x2ed   :  { %v126_v35 = vmul.f32 %v125_v32, %v121_v34 }
 0x2ef   :  { %v134_v37 = vpack.c.bf16 %v113_v27, %v126_v35 }
 0x2f0   :  { %v128_v38 = vpop.permute.xlu1 %127 }
 0x2f1   :  { %v133_v39 = vmul.f32 %v132_v36, %v128_v38  ;;  %234 = vmatpush3.bf16.msra.mxu1 %v134_v37 }
 0x2f2   :  { %235 = vmatprep.subr.bf16.mxu1 %v262_v0 }
 0x2f3   :  { %v135_v40 = vpack.c.bf16 %v262_v0, %v133_v39 }
 0x2f5   :  { %236 = vmatpush3.bf16.msra.mxu1 %v135_v40 }
 0x2f8   :  { %238 = vmatmul.mubr.msk.bf16.vlgmr.msra.gmra.mrb[0].mxu1 %vm137_vm2, %v136_v41 }
 0x3cb   :  { %v175_v42 = vpop.f32.mrb[0].mxu1 }
 0x3cc   :  { %182 = vadd.xlane.f32.xlu1 %v175_v42  ;;  %v239_v43 = vpop.f32.mrb[1].mxu1  ;;  %v181_v44 = vmul.f32 %v175_v42, %v175_v42 }
 0x3cd   :  { %v178_v45 = vpop.f32.mrb[2].mxu1 }
 0x3ce   :  { %184 = vadd.xlane.f32.xlu0 %v181_v44  ;;  %v240_v46 = vpop.f32.mrb[3].mxu1 }
 0x459   :  { %v183_v48 = vpop.xlane.xlu1 %182 }
 0x45a   :  { %v186_v49 = vmul.f32 0.0078125, %v183_v48 }
 0x45b   :  { %v185_v50 = vpop.xlane.xlu0 %184 }
 0x45c   :  { %v188_v51 = vmul.f32 %v186_v49, %v186_v49  ;;  %v187_v52 = vmul.f32 0.0078125, %v185_v50 }
 0x45e   :  { %v189_v53 = vsub.f32 %v187_v52, %v188_v51 }
 0x460   :  { %v190_v54 = vadd.f32 1e-05, %v189_v53 }
 0x462   :  { %260 = vrsqrt.f32 %v190_v54 }
 0x46c   :  { %v261_v56 = vpop.eup %260 }
 0x46d   :  { %v192_v57 = vmul.f32 %v261_v56, %v316_v17 }
 0x46f   :  { %v199_v58 = vmul.f32 %v192_v57, %v186_v49 }
 0x471   :  { %201 = vrot.lane.b32.xlu1 %v199_v58, %s266_s22 }
 0x475   :  { %195 = vperm.xlu1 %252, %v192_v57  }
 0x479   :  { %253 = vset.pattern.permute.xlu1 %v270_v59 }
 0x47a   :  { %116 = vperm.xlu1 %253, %v316_v17  }
 0x47e   :  { %254 = vset.pattern.permute.xlu1 %v269_v55 }
 0x4e3   :  { %v202_v60 = vpop.permute.xlu1 %201 }
 0x4e4   :  { %v204_v61 = vsub.f32 %v316_v17, %v202_v60 }
 0x4e6   :  { %207 = vperm.xlu1 %254, %v204_v61  }
 0x4f4   :  { %v196_v62 = vpop.permute.xlu1 %195 }
 0x4f5   :  { %v198_v0 = vmul.f32 %v196_v62, %v175_v42 }
 0x4f9   :  { %v117_v63 = vpop.permute.xlu1 %116 }
 0x4fa   :  { %v119_v2 = vadd.f32 %v117_v63, %v311_v5 }
 0x565   :  { %v208_v1 = vpop.permute.xlu1 %207 }
 0x566   :  { %v210_v3 = vadd.f32 %v208_v1, %v198_v0 }
 0x568   :  { %v211_v4 = vadd.f32 %v210_v3, %v119_v2 }
 0x56a   :  { %v212_v6 = vmax.f32 %v211_v4, 0.0 }
 0x56c   :  { %213 = vst [vmem:[%s343_s5] sm:$0xff] %v212_v6 }

</bundles_post_ra>
